<compile_context>
chip_gen: v6e
topology: v6e:2x2x1
jax: 0.10.0
libtpu: 0.0.40
codegen_flags: <defaults>
</compile_context>

<pallas_src>
import jax
import jax.numpy as jnp
from jax import lax
from jax.experimental import pallas as pl
from jax.experimental.pallas import tpu as pltpu

EPS = 1e-12  # F.normalize default eps


def spectral_norm_kernel(w_ref, u_ref, out_ref, sigma_ref, u_out_ref,
                         s_acc, tt_acc, inv_sig):
    p = pl.program_id(0)      # 0 = power-iteration / reduce pass, 1 = scaling pass
    i = pl.program_id(1)      # row-tile index
    nt = pl.num_programs(1)

    @pl.when(jnp.logical_and(p == 0, i == 0))
    def _init():
        s_acc[...] = jnp.zeros_like(s_acc)
        tt_acc[...] = jnp.zeros_like(tt_acc)

    @pl.when(p == 0)
    def _accumulate():
        w = w_ref[...]                        # (TM, D) native dtype (no f32 copy of W)
        u = u_ref[...]                        # (1, D) f32
        # t_tile = W_tile @ u as a lane reduce (lane-dense operands, MXU stays idle)
        t = jnp.sum(w * u, axis=-1, keepdims=True)               # (TM, 1) f32
        tt_acc[...] += jnp.sum(t * t, axis=0, keepdims=True)     # ||W u||^2 accumulator
        # s += W_tile^T @ t_tile as a sublane reduce
        s_acc[...] += jnp.sum(w * t, axis=0, keepdims=True)      # (1, D) f32

        @pl.when(i == nt - 1)
        def _finalize():
            s = s_acc[...]                                        # s = W^T (W u)
            ss = jnp.sum(s * s, axis=-1, keepdims=True)           # ||s||^2, (1, 1)
            tt = tt_acc[...]                                      # ||t||^2, (1, 1)
            inv_t = lax.rsqrt(jnp.maximum(tt, EPS * EPS))         # 1 / max(||t||, eps)
            inv_s = lax.rsqrt(jnp.maximum(ss, EPS * EPS))         # 1 / max(||s||, eps)
            sigma = jnp.sqrt(ss) * inv_t                          # == v^T W u' == ||W^T v||
            u_out_ref[...] = (s * inv_s).astype(u_out_ref.dtype)  # buffer update: u'
            sigma_ref[...] = sigma                                # buffer update: sigma
            inv_sig[...] = pl.reciprocal(sigma, approx=False)     # hoisted 1/sigma

    @pl.when(p == 1)
    def _scale():
        inv = inv_sig[...].astype(w_ref.dtype)                    # broadcast multiply,
        out_ref[...] = (w_ref[...] * inv).astype(out_ref.dtype)   # not a per-element divide


def _pick_row_tile(C):
    for cand in (512, 256, 128, 64, 32, 16, 8):
        if C % cand == 0:
            return cand
    return C  # ragged / tiny C: one whole block of rows


def spectral_normed_weight_forward(weight, u, *, tm=None):
    """Forward pass of SpectralNormedWeight.

    Returns (W / sigma, sigma, updated u) — the forward output plus the
    training-mode buffer updates."""
    C, D = weight.shape
    u2 = u.reshape(1, D).astype(jnp.float32)

    if tm is None:
        tm = _pick_row_tile(C)
    if C % tm != 0:
        tm = C
    nt = C // tm

    out_shapes = (
        jax.ShapeDtypeStruct((C, D), weight.dtype),   # W / sigma
        jax.ShapeDtypeStruct((1, 1), jnp.float32),    # sigma
        jax.ShapeDtypeStruct((1, D), jnp.float32),    # updated u
    )

    w_norm, sigma, u_new = pl.pallas_call(
        spectral_norm_kernel,
        out_shape=out_shapes,
        grid=(2, nt),
        in_specs=[
            pl.BlockSpec((tm, D), lambda p, i: (i, 0)),   # W row tiles (re-streamed in pass 1)
            pl.BlockSpec((1, D), lambda p, i: (0, 0)),    # u, resident
        ],
        out_specs=(
            # During pass 0 every step maps to block 0 (kept resident, never flushed
            # until pass 1 overwrites it), so no garbage tiles reach HBM; pass 1
            # writes tile i with the scaled weight.
            pl.BlockSpec((tm, D), lambda p, i: (i * p, 0)),
            pl.BlockSpec((1, 1), lambda p, i: (0, 0)),
            pl.BlockSpec((1, D), lambda p, i: (0, 0)),
        ),
        scratch_shapes=[
            pltpu.VMEM((1, D), jnp.float32),   # s = W^T (W u) accumulator
            pltpu.VMEM((1, 1), jnp.float32),   # ||W u||^2 accumulator
            pltpu.VMEM((1, 1), jnp.float32),   # 1 / sigma (hoisted reciprocal)
        ],
        compiler_params=pltpu.CompilerParams(
            # Pass axis must run sequentially (pass 1 needs sigma); tile axis feeds a
            # shared scratch accumulator, so both stay "arbitrary".
            dimension_semantics=("arbitrary", "arbitrary"),
            vmem_limit_bytes=32 * 1024 * 1024,
        ),
    )(weight, u2)

    return w_norm, sigma[0, 0], u_new.reshape(D)


def init_spectral_normed_weight(weight):
    """Mirrors SpectralNormedWeight.__init__: SVD-based init of buffers.
    # TODO(synk): SVD has no Pallas equivalent; this buffer init stays in plain JAX.
    """
    _, s, vh = jnp.linalg.svd(weight, full_matrices=False)
    u0 = vh[0]                    # first right singular vector, shape (D,)
    sigma0 = s[0] * jnp.ones((1,), dtype=jnp.float32)
    return u0, sigma0


def _reference_forward(weight, u):
    """Pure-JAX reference mirroring the PyTorch module (correctness check)."""
    v = weight @ u
    v = v / jnp.maximum(jnp.linalg.norm(v), EPS)
    u_new = weight.T @ v
    u_new = u_new / jnp.maximum(jnp.linalg.norm(u_new), EPS)
    sigma = jnp.einsum('c,cd,d->', v, weight, u_new)
    return weight / sigma, sigma, u_new


if __name__ == "__main__":
    key = jax.random.PRNGKey(0)
    C, D = 64, 128  # small Linear-style weight (out_features, in_features); D lane-dense
    weight = jax.random.normal(key, (C, D), dtype=jnp.float32) * 0.05

    # Module __init__: SVD-initialized power-iteration vector u and sigma buffer.
    u0, sigma0 = init_spectral_normed_weight(weight)

    # Forward pass (Pallas kernel). tm=16 -> grid=(2, 4): exercises the tiled
    # accumulation pass and the scaling pass.
    w_norm, sigma, u_new = spectral_normed_weight_forward(weight, u0, tm=16)
    jax.block_until_ready((w_norm, sigma, u_new))

    # Sanity check against the plain-JAX reference.
    ref_w, ref_sigma, ref_u = _reference_forward(weight, u0)
    assert jnp.allclose(w_norm, ref_w, atol=1e-5, rtol=1e-4)
    assert jnp.allclose(sigma, ref_sigma, atol=1e-5, rtol=1e-4)
    assert jnp.allclose(u_new, ref_u, atol=1e-5, rtol=1e-4)

    print("KERNEL_OK")
</pallas_src>

<mosaic_0001>
module attributes {stable_mosaic.version = 11 : i64} {
  func.func @spectral_norm_kernel(%arg0: i32, %arg1: i32, %arg2: memref<16x128xf32, #tpu.memory_space<vmem>>, %arg3: memref<1x128xf32, #tpu.memory_space<vmem>>, %arg4: memref<16x128xf32, #tpu.memory_space<vmem>>, %arg5: memref<1x1xf32, #tpu.memory_space<vmem>>, %arg6: memref<1x128xf32, #tpu.memory_space<vmem>>, %arg7: memref<1x128xf32, #tpu.memory_space<vmem>>, %arg8: memref<1x1xf32, #tpu.memory_space<vmem>>, %arg9: memref<1x1xf32, #tpu.memory_space<vmem>>) attributes {dimension_semantics = [#tpu.dimension_semantics<arbitrary>, #tpu.dimension_semantics<arbitrary>], iteration_bounds = array<i64: 2, 4>, scalar_prefetch = 0 : i64, scratch_operands = 3 : i64, tpu.core_type = #tpu.core_type<tc>, window_params = [{transform_indices = @transform_0, window_bounds = array<i64: 16, 128>}, {pipeline_mode = #tpu.pipeline_mode<synchronous>, transform_indices = @transform_1, window_bounds = array<i64: 1, 128>}, {transform_indices = @transform_2, window_bounds = array<i64: 16, 128>}, {pipeline_mode = #tpu.pipeline_mode<synchronous>, transform_indices = @transform_3, window_bounds = array<i64: 1, 1>}, {pipeline_mode = #tpu.pipeline_mode<synchronous>, transform_indices = @transform_4, window_bounds = array<i64: 1, 128>}]} {
    %c0_i32 = arith.constant 0 : i32
    %0 = arith.cmpi eq, %arg0, %c0_i32 : i32
    %c0_i32_0 = arith.constant 0 : i32
    %1 = arith.cmpi eq, %arg1, %c0_i32_0 : i32
    %2 = arith.andi %0, %1 : i1
    %3 = arith.extui %2 : i1 to i32
    %c0_i32_1 = arith.constant 0 : i32
    %4 = arith.cmpi ne, %3, %c0_i32_1 : i32
    scf.if %4 {
      %cst = arith.constant 0.000000e+00 : f32
      %11 = vector.broadcast %cst : f32 to vector<1x128xf32>
      %c0 = arith.constant 0 : index
      %c0_5 = arith.constant 0 : index
      %12 = vector.load %arg7[%c0, %c0_5] : memref<1x128xf32, #tpu.memory_space<vmem>>, vector<1x128xf32>
      tpu.vector_store %arg7[%c0, %c0_5], %11 {strides = array<i32>} : memref<1x128xf32, #tpu.memory_space<vmem>>, vector<1x128xf32>,
      %cst_6 = arith.constant 0.000000e+00 : f32
      %13 = vector.broadcast %cst_6 : f32 to vector<1x1xf32>
      %c0_7 = arith.constant 0 : index
      %c0_8 = arith.constant 0 : index
      %14 = vector.load %arg8[%c0_7, %c0_8] : memref<1x1xf32, #tpu.memory_space<vmem>>, vector<1x1xf32>
      tpu.vector_store %arg8[%c0_7, %c0_8], %13 {strides = array<i32>} : memref<1x1xf32, #tpu.memory_space<vmem>>, vector<1x1xf32>,
    } else {
    }
    %c0_i32_2 = arith.constant 0 : i32
    %5 = arith.cmpi eq, %arg0, %c0_i32_2 : i32
    %6 = arith.extui %5 : i1 to i32
    %c0_i32_3 = arith.constant 0 : i32
    %7 = arith.cmpi ne, %6, %c0_i32_3 : i32
    scf.if %7 {
      %c0 = arith.constant 0 : index
      %c0_5 = arith.constant 0 : index
      %11 = vector.load %arg2[%c0, %c0_5] : memref<16x128xf32, #tpu.memory_space<vmem>>, vector<16x128xf32>
      %c0_6 = arith.constant 0 : index
      %c0_7 = arith.constant 0 : index
      %12 = vector.load %arg3[%c0_6, %c0_7] : memref<1x128xf32, #tpu.memory_space<vmem>>, vector<1x128xf32>
      %13 = vector.broadcast %12 : vector<1x128xf32> to vector<16x128xf32>
      %14 = arith.mulf %11, %13 : vector<16x128xf32>
      %cst = arith.constant dense<0.000000e+00> : vector<16xf32>
      %15 = vector.multi_reduction <add>, %14, %cst [1] : vector<16x128xf32> to vector<16xf32>
      %16 = vector.shape_cast %15 : vector<16xf32> to vector<16x1xf32>
      %c0_8 = arith.constant 0 : index
      %c0_9 = arith.constant 0 : index
      %17 = vector.load %arg8[%c0_8, %c0_9] : memref<1x1xf32, #tpu.memory_space<vmem>>, vector<1x1xf32>
      %18 = arith.mulf %16, %16 : vector<16x1xf32>
      %cst_10 = arith.constant dense<0.000000e+00> : vector<1xf32>
      %19 = vector.multi_reduction <add>, %18, %cst_10 [0] : vector<16x1xf32> to vector<1xf32>
      %20 = vector.shape_cast %19 : vector<1xf32> to vector<1x1xf32>
      %21 = arith.addf %17, %20 : vector<1x1xf32>
      %c0_11 = arith.constant 0 : index
      %c0_12 = arith.constant 0 : index
      %22 = vector.load %arg8[%c0_11, %c0_12] : memref<1x1xf32, #tpu.memory_space<vmem>>, vector<1x1xf32>
      tpu.vector_store %arg8[%c0_11, %c0_12], %21 {strides = array<i32>} : memref<1x1xf32, #tpu.memory_space<vmem>>, vector<1x1xf32>,
      %c0_13 = arith.constant 0 : index
      %c0_14 = arith.constant 0 : index
      %23 = vector.load %arg7[%c0_13, %c0_14] : memref<1x128xf32, #tpu.memory_space<vmem>>, vector<1x128xf32>
      %24 = vector.broadcast %16 : vector<16x1xf32> to vector<16x128xf32>
      %25 = arith.mulf %11, %24 : vector<16x128xf32>
      %cst_15 = arith.constant dense<0.000000e+00> : vector<128xf32>
      %26 = vector.multi_reduction <add>, %25, %cst_15 [0] : vector<16x128xf32> to vector<128xf32>
      %27 = vector.shape_cast %26 : vector<128xf32> to vector<1x128xf32>
      %28 = arith.addf %23, %27 : vector<1x128xf32>
      %c0_16 = arith.constant 0 : index
      %c0_17 = arith.constant 0 : index
      %29 = vector.load %arg7[%c0_16, %c0_17] : memref<1x128xf32, #tpu.memory_space<vmem>>, vector<1x128xf32>
      tpu.vector_store %arg7[%c0_16, %c0_17], %28 {strides = array<i32>} : memref<1x128xf32, #tpu.memory_space<vmem>>, vector<1x128xf32>,
      %c3_i32 = arith.constant 3 : i32
      %30 = arith.cmpi eq, %arg1, %c3_i32 : i32
      %31 = arith.extui %30 : i1 to i32
      %c0_i32_18 = arith.constant 0 : i32
      %32 = arith.cmpi ne, %31, %c0_i32_18 : i32
      scf.if %32 {
        %c0_19 = arith.constant 0 : index
        %c0_20 = arith.constant 0 : index
        %33 = vector.load %arg7[%c0_19, %c0_20] : memref<1x128xf32, #tpu.memory_space<vmem>>, vector<1x128xf32>
        %34 = arith.mulf %33, %33 : vector<1x128xf32>
        %cst_21 = arith.constant dense<0.000000e+00> : vector<1xf32>
        %35 = vector.multi_reduction <add>, %34, %cst_21 [1] : vector<1x128xf32> to vector<1xf32>
        %36 = vector.shape_cast %35 : vector<1xf32> to vector<1x1xf32>
        %c0_22 = arith.constant 0 : index
        %c0_23 = arith.constant 0 : index
        %37 = vector.load %arg8[%c0_22, %c0_23] : memref<1x1xf32, #tpu.memory_space<vmem>>, vector<1x1xf32>
        %cst_24 = arith.constant 1.000000e-24 : f32
        %38 = vector.broadcast %cst_24 : f32 to vector<1x1xf32>
        %39 = arith.maximumf %37, %38 : vector<1x1xf32>
        %40 = math.rsqrt %39 : vector<1x1xf32>
        %cst_25 = arith.constant 1.000000e-24 : f32
        %41 = vector.broadcast %cst_25 : f32 to vector<1x1xf32>
        %42 = arith.maximumf %36, %41 : vector<1x1xf32>
        %43 = math.rsqrt %42 : vector<1x1xf32>
        %44 = math.sqrt %36 : vector<1x1xf32>
        %45 = arith.mulf %44, %40 : vector<1x1xf32>
        %46 = vector.broadcast %43 : vector<1x1xf32> to vector<1x128xf32>
        %47 = arith.mulf %33, %46 : vector<1x128xf32>
        %c0_26 = arith.constant 0 : index
        %c0_27 = arith.constant 0 : index
        %48 = vector.load %arg6[%c0_26, %c0_27] : memref<1x128xf32, #tpu.memory_space<vmem>>, vector<1x128xf32>
        tpu.vector_store %arg6[%c0_26, %c0_27], %47 {strides = array<i32>} : memref<1x128xf32, #tpu.memory_space<vmem>>, vector<1x128xf32>,
        %c0_28 = arith.constant 0 : index
        %c0_29 = arith.constant 0 : index
        %49 = vector.load %arg5[%c0_28, %c0_29] : memref<1x1xf32, #tpu.memory_space<vmem>>, vector<1x1xf32>
        tpu.vector_store %arg5[%c0_28, %c0_29], %45 {strides = array<i32>} : memref<1x1xf32, #tpu.memory_space<vmem>>, vector<1x1xf32>,
        %50 = tpu.reciprocal %45 : vector<1x1xf32> -> vector<1x1xf32>
        %c0_30 = arith.constant 0 : index
        %c0_31 = arith.constant 0 : index
        %51 = vector.load %arg9[%c0_30, %c0_31] : memref<1x1xf32, #tpu.memory_space<vmem>>, vector<1x1xf32>
        tpu.vector_store %arg9[%c0_30, %c0_31], %50 {strides = array<i32>} : memref<1x1xf32, #tpu.memory_space<vmem>>, vector<1x1xf32>,
      } else {
      }
    } else {
    }
    %c1_i32 = arith.constant 1 : i32
    %8 = arith.cmpi eq, %arg0, %c1_i32 : i32
    %9 = arith.extui %8 : i1 to i32
    %c0_i32_4 = arith.constant 0 : i32
    %10 = arith.cmpi ne, %9, %c0_i32_4 : i32
    scf.if %10 {
      %c0 = arith.constant 0 : index
      %c0_5 = arith.constant 0 : index
      %11 = vector.load %arg9[%c0, %c0_5] : memref<1x1xf32, #tpu.memory_space<vmem>>, vector<1x1xf32>
      %c0_6 = arith.constant 0 : index
      %c0_7 = arith.constant 0 : index
      %12 = vector.load %arg2[%c0_6, %c0_7] : memref<16x128xf32, #tpu.memory_space<vmem>>, vector<16x128xf32>
      %13 = vector.broadcast %11 : vector<1x1xf32> to vector<16x128xf32>
      %14 = arith.mulf %12, %13 : vector<16x128xf32>
      %c0_8 = arith.constant 0 : index
      %c0_9 = arith.constant 0 : index
      %15 = vector.load %arg4[%c0_8, %c0_9] : memref<16x128xf32, #tpu.memory_space<vmem>>, vector<16x128xf32>
      tpu.vector_store %arg4[%c0_8, %c0_9], %14 {strides = array<i32>} : memref<16x128xf32, #tpu.memory_space<vmem>>, vector<16x128xf32>,
    } else {
    }
    return
  }
  func.func @transform_0(%arg0: i32, %arg1: i32) -> (i32, i32) {
    %c0_i32 = arith.constant 0 : i32
    %c0_i32_0 = arith.constant 0 : i32
    return %arg1, %c0_i32 : i32, i32
  }
  func.func @transform_1(%arg0: i32, %arg1: i32) -> (i32, i32) {
    %c0_i32 = arith.constant 0 : i32
    %c0_i32_0 = arith.constant 0 : i32
    %c0_i32_1 = arith.constant 0 : i32
    return %c0_i32, %c0_i32_0 : i32, i32
  }
  func.func @transform_2(%arg0: i32, %arg1: i32) -> (i32, i32) {
    %0 = arith.muli %arg1, %arg0 : i32
    %c0_i32 = arith.constant 0 : i32
    %c0_i32_0 = arith.constant 0 : i32
    return %0, %c0_i32 : i32, i32
  }
  func.func @transform_3(%arg0: i32, %arg1: i32) -> (i32, i32) {
    %c0_i32 = arith.constant 0 : i32
    %c0_i32_0 = arith.constant 0 : i32
    %c0_i32_1 = arith.constant 0 : i32
    return %c0_i32, %c0_i32_0 : i32, i32
  }
  func.func @transform_4(%arg0: i32, %arg1: i32) -> (i32, i32) {
    %c0_i32 = arith.constant 0 : i32
    %c0_i32_0 = arith.constant 0 : i32
    %c0_i32_1 = arith.constant 0 : i32
    return %c0_i32, %c0_i32_0 : i32, i32
  }
}

</mosaic_0001>

<bundles_post_ra>
// kernel: tpu_custom_call.1
= control target key start
LH: loop header
LB: loop body
LE: loop exit
PB: predicated region body
PF: predicated region fallthrough
CT: control target
= control target key end

     0   :  { %10 = vsyncpa [#allocation6], 0  ;;  %s1108_s0 = inlined_call_operand.hbm [shape: f32[64,128], index: 0, kind: input, shape index: {}]   ;;  %s1109_s1 = inlined_call_operand.vmem [shape: f32[1,128], index: 1, kind: input, shape index: {}]   ;;  %s1110_s2 = inlined_call_operand.hbm [shape: f32[64,128], index: 2, kind: output, shape index: {0}]   ;;  %s1111_s3 = inlined_call_operand.hbm [shape: f32[1,1], index: 3, kind: output, shape index: {1}]   ;;  %s1112_s4 = inlined_call_operand.hbm [shape: f32[1,128], index: 4, kind: output, shape index: {2}]  }
   0x1   :  { %12 = vsyncpa [#allocation6 + $0x1], 0 }
   0x2   :  { %13 = vsyncpa [#allocation7], 0 }
   0x3   :  { %15 = vsyncpa [#allocation7 + $0x1], 0 }
   0x4   :  { %16 = vsyncpa [#allocation10], 0  ;;  %s865_s15 = smov 0   ;;  %s867_s16 = smov 0  }
   0x5   :  { %s869_s17 = smov 0   ;;  %s871_s18 = smov 0  }
   0x6   :  { %s873_s19 = smov 0   ;;  %s875_s20 = smov 0  }
   0x7   :  { %s877_s21 = smov 0   ;;  %s879_s22 = smov 0  }
   0x8   :  { %s881_s23 = smov 0   ;;  %s883_s24 = smov 0  }
   0x9   :  { %s885_s25 = smov 0  }
   0xa LB: > { %1118 = sst [smem:[#allocation15_spill]] %s808_s20  ;;  %s471_s26 = sadd.s32 4294967295, %s828_s25   ;;  %s828_s25 = sphi %s885_s25, %s22_s25   ;;  %s824_s24 = sphi %s883_s24, %s1136_s24   ;;  %s820_s23 = sphi %s881_s23, %s1135_s23   ;;  %s816_s22 = sphi %s879_s22, %s1134_s22   ;;  %s812_s21 = sphi %s877_s21, %s1133_s21   ;;  %s808_s20 = sphi %s875_s20, %s1132_s20   ;;  %s804_s19 = sphi %s873_s19, %s1141_s19   ;;  %s800_s18 = sphi %s871_s18, %s1140_s18   ;;  %s796_s17 = sphi %s869_s17, %s1139_s17   ;;  %s792_s16 = sphi %s867_s16, %s1138_s16   ;;  %s788_s15 = sphi %s865_s15, %s1137_s15  }
   0xb   : > { %1119 = sst [smem:[#allocation16_spill]] %s820_s23  ;;  %s472_s27 = sadd.s32 4294967294, %s828_s25  }
   0xc   : > { %1120 = sst [smem:[#allocation17_spill]] %s824_s24  ;;  %s31_s28 = sadd.s32 1, %s820_s23 }
   0xd   : > { %s34_s29 = sadd.s32 1, %s824_s24  ;;  %p32_p0 = scmp.ge.s32.totalorder %s31_s28, 4 }
   0xe   : > { %s41_s30 = sadd.s32 1, %s808_s20  ;;  %p48_p1 = scmp.ne.s32.totalorder %s808_s20, %s804_s19 }
   0xf   : > { %p49_p2 = scmp.eq.s32.totalorder %s828_s25, 0  ;;  %s1143_s28 = smov (%p32_p0, %s31_s28), 0 }
  0x10   : > { %1121 = sst [smem:[#allocation18_spill]] %s1143_s28  ;;  %s1145_s29 = smov (!%p32_p0, %s34_s29), %s824_s24 }
  0x11   : > { %s38_s5 = ssub.s32 %s820_s23, %s1143_s28  ;;  %p931_p3 = por %p49_p2, %p48_p1 }
  0x12   : > { %p36_p4 = scmp.ge.s32.totalorder %s1145_s29, 2  ;;  %p39_p5 = scmp.eq.s32.totalorder %s38_s5, 0 }
  0x13   : > { %p54_p6 = scmp.ne.s32.totalorder %s804_s19, %s800_s18  ;;  %p55_p7 = scmp.eq.s32.totalorder %s471_s26, 0 }
  0x14   : > { %s1147_s29 = smov (%p36_p4, %s1145_s29), 0  ;;  %s85_s9 = smul.u32 %s820_s23, %s824_s24 }
  0x15   : > { %1123 = sst [smem:[#allocation19_spill]] %s1147_s29  ;;  %p941_p8 = por %p55_p7, %p54_p6 }
  0x16   : > { %s939_s7 = scalar_select %p39_p5, %s808_s20, %s41_s30  }
  0x17   : > { %s86_s10 = smul.u32 %s1147_s29, %s1143_s28  ;;  %s90_s11 = sadd.s32 1, %s796_s17 }
  0x18   : > { %1124 = sst [smem:[#allocation20_spill]] %s939_s7  ;;  %p100_p9 = scmp.ne.s32.totalorder %s796_s17, %s792_s16 }
  0x19   : > { %p952_p10 = scmp.eq.s32.totalorder %s471_s26, 7  ;;  %s87_s13 = ssub.s32 %s85_s9, %s86_s10 }
  0x1a   : > { %p106_p11 = scmp.ne.s32.totalorder %s792_s16, %s788_s15  ;;  %p88_p12 = scmp.eq.s32.totalorder %s87_s13, 0 }
  0x1b   : > { %p960_p13 = por %p952_p10, %p100_p9  ;;  %p107_p0 = scmp.eq.s32.totalorder %s472_s27, 7 }
  0x1c   : > { %s965_s18 = scalar_select %p88_p12, %s796_s17, %s90_s11  }
  0x1d   : > { %p967_p1 = por %p107_p0, %p106_p11  ;;  %p517_p2 = scmp.lt.s32.totalorder %s828_s25, 8 }
  0x1e   : > { %s172_s26 = sand.u32 1, %s808_s20   ;;  %s495_s5 = sshll.u32 %s820_s23, 8 }
  0x1f   : > { %s1128_s30 = scalar_select %p967_p1, 1, 0 }
  0x20   : > { %s475_s29 = sshll.u32 %s172_s26, 4  ;;  %s182_s10 = scalar_lea.hbm %s1108_s0, %s495_s5 }
  0x21   : > { %s176_s13 = scalar_lea.vmem [#allocation5], %s475_s29  ;;  %p979_p4 = pnand %p517_p2, %p931_p3 }
  0x22   : > { %s183_s24 = sshll.u32 %s176_s13, 4  ;;  %s173_s27 = scalar_lea.sflag [#allocation6], %s172_s26  ;;  %s184_s24 = int_to_ptr.vmem [resolvable:$true] %s183_s24 }
  0x23   : > { %p630_p5 = pneg %p979_p4  ;;  %s641_s11 = scalar_lea.vmem %s184_s24, 256 }
  0x24   : > { %p642_p6 = scmp.ne.s32.totalorder %s184_s24, %s641_s11  ;;  %s830_s23 = smov [#allocation5]  }
  0x25   : > { %s646_s20 = sshll.u32 %s830_s23, 4  ;;  %s647_s20 = int_to_ptr.vmem [resolvable:$false] %s646_s20 }
  0x26   : > { %p644_p7 = pnand %p642_p6, %p630_p5  ;;  %s648_s28 = scalar_lea.vmem %s647_s20, 512 }
  0x27   : > { %p649_p11 = scmp.lt.s32.totalorder %s184_s24, %s647_s20  ;;  %p650_p12 = scmp.lt.s32.totalorder %s648_s28, %s641_s11 }
  0x28   : > { %p645_p9 = pneg %p644_p7 }
  0x29   : > { %p651_p0 = por %p650_p12, %p649_p11 }
  0x2b   : > { %p652_p3 = pnand %p651_p0, %p645_p9 }
  0x2d   : > { %655 = shalt.err (!%p652_p3)
}
  0x2e   : > { %s831_s29 = smov 128   ;;  %s832_s6 = smov 8  }
  0x2f   : > { %512 = dma.hbm_to_vmem [thread:$0]  (!%p979_p4), %s182_s10, 256, %s184_s24, %s173_s27, %s831_s29, %s831_s29, %s832_s6  }
  0x30   : > { %p478_p2 = scmp.ge.s32.totalorder %s828_s25, 1  ;;  %p191_p1 = scmp.lt.s32.totalorder %s828_s25, 9 }
  0x32   : > { %p192_p5 = pnand %p478_p2, %p191_p1 }
  0x33   : > { %s197_s23 = sand.u32 (!%p192_p5), 1, %s804_s19  }
  0x34   : > { %195 = sbr.rel (%p192_p5) target bundleno = 612 (0x264), region = 28  ;;  %s479_s26 = sshll.u32 (!%p192_p5), %s197_s23, 4 }
  0x35   : > { %s198_s20 = scalar_lea.sflag (!%p192_p5), [#allocation6], %s197_s23  ;;  %s990_s5 = scalar_lea.vmem (!%p192_p5), [#allocation5], %s479_s26 }
  0x39   : > { %775 = dma.done.wait (%p941_p8), %s198_s20, 256  }
  0x3a   : > { %777 = vsyncadd (%p941_p8), %s198_s20, 4294967040  ;;  %s219_s24 = sand.u32 1, %s792_s16   ;;  %p229_p4 = scmp.eq.s32.totalorder %s816_s22, 0 }
  0x3b   : > { %s480_s7 = sshll.u32 %s219_s24, 4  ;;  %p230_p1 = scmp.eq.s32.totalorder %s812_s21, 0 }
  0x3c   : > { %s1001_s9 = scalar_lea.vmem [#allocation8], %s480_s7 }
  0x3d   : > { %p231_p6 = pnand %p230_p1, %p229_p4 }
  0x3f   : > { %234 = sbr.rel (%p231_p6) target bundleno = 70 (0x46), region = 36 }
  0x44   : > { %vm236_vm0 = vcmask 0   ;;  %v833_v0 = vmov 0.0  }
  0x45   : > { %235 = vst [vmem:[#allocation2] sm:$0x1] %v833_v0  ;;  %237 = vst.msk [vmem:[#allocation3] sm:$0x1] %vm236_vm0, %v833_v0 }
  0x46 PF: > { %p481_p8 = scmp.ne.s32.totalorder %s816_s22, 0 }
  0x47   : > { %p483_p7 = scmp.ne.s32.totalorder (!%p481_p8), %s812_s21, 3 }
  0x48   : > { %240 = sbr.rel (%p481_p8) target bundleno = 424 (0x1a8), region = 40 }
  0x4d   : > { %v241_v1 = vld [vmem:[%s990_s5] sm:$0xff]  ;;  %v482_v2 = vld [vmem:[%s1109_s1] ss:$0 sm:$0xff]  ;;  %v256_v24 = vld [vmem:[#allocation3] sm:$0x1]  ;;  %vm267_vm1 = vcmask 0  }
  0x4e   : > { %v242_v3 = vld [vmem:[%s990_s5 + $0x8] sm:$0xff]  ;;  %v250_v4 = vmul.f32 %v482_v2, %v241_v1 }
  0x4f   : > { %v251_v5 = vmul.f32 %v482_v2, %v242_v3  ;;  %v269_v25 = vld [vmem:[#allocation2] sm:$0x1] }
  0x50   : > { %252 = vadd.xlane.f32.xlu0 %v250_v4 }
  0x54   : > { %254 = vadd.xlane.f32.xlu0 %v251_v5 }
  0xd9   : > { %v253_v6 = vpop.xlane.xlu0 %252 }
  0xda   : > { %v257_v8 = vmul.f32 %v253_v6, %v253_v6  ;;  %v270_v9 = vmul.f32 %v253_v6, %v241_v1 }
  0xdd   : > { %v255_v7 = vpop.xlane.xlu0 %254 }
  0xde   : > { %v258_v10 = vmul.f32 %v255_v7, %v255_v7  ;;  %v271_v11 = vmul.f32 %v255_v7, %v242_v3 }
  0xe0   : > { %v259_v12 = vadd.f32 %v258_v10, %v257_v8  ;;  %v272_v13 = vadd.f32 %v271_v11, %v270_v9 }
  0xe2   : > { %v260_v14 = vrot.slane %v259_v12, 4  ;;  %v273_v15 = vrot.slane %v272_v13, 4 }
  0xe4   : > { %v261_v16 = vadd.f32 %v260_v14, %v259_v12  ;;  %v274_v17 = vadd.f32 %v273_v15, %v272_v13 }
  0xe6   : > { %v262_v18 = vrot.slane %v261_v16, 2  ;;  %v275_v19 = vrot.slane %v274_v17, 2 }
  0xe8   : > { %v263_v20 = vadd.f32 %v262_v18, %v261_v16  ;;  %v276_v21 = vadd.f32 %v275_v19, %v274_v17 }
  0xea   : > { %v264_v22 = vrot.slane %v263_v20, 1  ;;  %v277_v23 = vrot.slane %v276_v21, 1 }
  0xec   : > { %v265_v26 = vadd.f32 %v264_v22, %v263_v20  ;;  %v278_v27 = vadd.f32 %v277_v23, %v276_v21  ;;  %284 = sbr.rel (%p483_p7) target bundleno = 424 (0x1a8), region = 44 }
  0xee   : > { %v266_v28 = vadd.f32 %v265_v26, %v256_v24  ;;  %v279_v29 = vadd.f32 %v278_v27, %v269_v25 }
  0xf0   : > { %268 = vst.msk [vmem:[#allocation3] sm:$0x1] %vm267_vm1, %v266_v28  ;;  %280 = vst [vmem:[#allocation2] sm:$0x1] %v279_v29 }
  0xf1   : > { %vm287_vm2 = vcmask 1040384  }
  0xf7   : > { %v285_v30 = vld [vmem:[#allocation2] sm:$0x1]  ;;  %v291_v33 = vld [vmem:[#allocation3] sm:$0x1] }
  0xf8   : > { %v286_v31 = vmul.f32 %v285_v30, %v285_v30  ;;  %v292_v34 = vmax.f32 %v291_v33, 1e-24 }
  0xfa   : > { %v288_v32 = vsel %vm287_vm2, %v286_v31, 0.0 }
  0xfb   : > { %289 = vadd.xlane.f32.xlu0 %v288_v32 }
 0x184   : > { %v290_v35 = vpop.xlane.xlu0 %289 }
 0x185   : > { %v294_v36 = vmax.f32 %v290_v35, 1e-24  ;;  %619 = vrsqrt.f32 %v290_v35  ;;  %vm298_vm3 = vcmp.eq.f32.partialorder %v290_v35, inf  ;;  %v301_v41 = vand.u32 2147483648, %v290_v35 }
 0x186   : > { %621 = vrsqrt.f32 %v292_v34  ;;  %vm300_vm4 = vcmp.eq.f32.partialorder %v290_v35, 0.0 }
 0x187   : > { %623 = vrsqrt.f32 %v294_v36 }
 0x192   : > { %v620_v37 = vpop.eup %619 }
 0x193   : > { %v622_v38 = vpop.eup %621  ;;  %v297_v39 = vmul.f32 %v620_v37, %v290_v35 }
 0x194   : > { %v624_v40 = vpop.eup %623 }
 0x195   : > { %v299_v42 = vsel %vm298_vm3, %v290_v35, %v297_v39  ;;  %v304_v43 = vmul.f32 %v624_v40, %v285_v30 }
 0x196   : > { %v302_v44 = vsel %vm300_vm4, %v301_v41, %v299_v42 }
 0x197   : > { %v303_v45 = vmul.f32 %v622_v38, %v302_v44  ;;  %305 = vst [vmem:[#allocation11] sm:$0x1] %v304_v43 }
 0x199   : > { %306 = vst.msk [vmem:[#allocation9] sm:$0x1] %vm267_vm1, %v303_v45  ;;  %625 = vrcp.f32 %v303_v45 }
 0x1a6   : > { %v626_v46 = vpop.eup %625 }
 0x1a7   : > { %308 = vst.msk [vmem:[#allocation4] sm:$0x1] %vm267_vm1, %v626_v46 }
 0x1a8 PF: > { %p484_p9 = scmp.ne.s32.totalorder %s816_s22, 1 }
 0x1aa   : > { %312 = sbr.rel (%p484_p9) target bundleno = 560 (0x230), region = 48 }
 0x1af   : > { %v485_v47 = vld [vmem:[#allocation4] ss:$0 sm:$0xff]  ;;  %v834_v48 = vmov 0   ;;  %v314_v49 = vld [vmem:[%s990_s5] sm:$0xff] }
 0x1b0   : > { %627 = vset.pattern.permute.xlu0 %v834_v48  ;;  %v315_v50 = vld [vmem:[%s990_s5 + $0x8] sm:$0xff] }
 0x1b1   : > { %322 = vperm.xlu0 %627, %v485_v47  }
 0x22c   : > { %v323_v51 = vpop.permute.xlu0 %322 }
 0x22d   : > { %v325_v52 = vmul.f32 %v323_v51, %v314_v49  ;;  %v326_v53 = vmul.f32 %v323_v51, %v315_v50 }
 0x22f   : > { %327 = vst [vmem:[%s1001_s9] sm:$0xff] %v325_v52  ;;  %328 = vst [vmem:[%s1001_s9 + $0x8] sm:$0xff] %v326_v53 }
 0x230 PF: > { %s835_s13 = smov [#allocation9]   ;;  %s337_s11 = smul.u32 %s812_s21, %s816_s22 }
 0x231   : > { %s358_s27 = sshll.u32 %s835_s13, 4  ;;  %s359_s27 = int_to_ptr.vmem [resolvable:$true] %s358_s27 }
 0x232   : > { %s656_s28 = scalar_lea.vmem %s359_s27, 16  ;;  %s662_s29 = scalar_lea.vmem %s359_s27, 32 }
 0x233   : > { %p657_p11 = scmp.ne.s32.totalorder %s359_s27, %s656_s28  ;;  %p663_p3 = scmp.lt.s32.totalorder %s359_s27, %s359_s27 }
 0x234   : > { %p664_p2 = scmp.lt.s32.totalorder %s662_s29, %s656_s28 }
 0x235   : > { %p658_p12 = pnand %p657_p11, %p952_p10 }
 0x236   : > { %p665_p5 = por %p664_p2, %p663_p3 }
 0x237   : > { %p659_p0 = pneg %p658_p12 }
 0x239   : > { %p666_p4 = pnand %p665_p5, %p659_p0 }
 0x23b   : > { %669 = shalt.err (!%p666_p4)
}
 0x23c   : > { %501 = dma.vmem_to_hbm [thread:$0]  (%p952_p10), %s359_s27, 16, %s1111_s3, [#allocation10]  }
 0x23d   : > { %s496_s21 = sshll.u32 %s337_s11, 8  ;;  %s344_s22 = sshll.u32 %s1001_s9, 4  ;;  %s1033_s22 = int_to_ptr.vmem [resolvable:$true] %s344_s22 }
 0x23e   : > { %s1031_s5 = scalar_lea.hbm %s1110_s2, %s496_s21  ;;  %s1037_s7 = scalar_lea.sflag [#allocation7], %s219_s24 }
 0x23f   : > { %s680_s8 = scalar_lea.vmem %s1033_s22, 256  ;;  %s836_s10 = smov [#allocation8]  }
 0x240   : > { %p681_p1 = scmp.ne.s32.totalorder %s1033_s22, %s680_s8  ;;  %s684_s9 = sshll.u32 %s836_s10, 4  ;;  %s685_s9 = int_to_ptr.vmem [resolvable:$false] %s684_s9 }
 0x241   : > { %s686_s13 = scalar_lea.vmem %s685_s9, 512  ;;  %p687_p7 = scmp.lt.s32.totalorder %s1033_s22, %s685_s9 }
 0x242   : > { %p682_p6 = pnand %p681_p1, %p960_p13  ;;  %p688_p9 = scmp.lt.s32.totalorder %s686_s13, %s680_s8 }
 0x244   : > { %p683_p8 = pneg %p682_p6  ;;  %p689_p11 = por %p688_p9, %p687_p7 }
 0x246   : > { %p690_p12 = pnand %p689_p11, %p683_p8 }
 0x248   : > { %693 = shalt.err (!%p690_p12)
}
 0x249   : > { %s694_s24 = scalar_lea.hbm %s1031_s5, 256  ;;  %s698_s28 = scalar_lea.hbm %s1110_s2, 1024 }
 0x24a   : > { %p695_p0 = scmp.ne.s32.totalorder %s1031_s5, %s694_s24  ;;  %p699_p5 = scmp.lt.s32.totalorder %s1031_s5, %s1110_s2 }
 0x24b   : > { %p700_p4 = scmp.lt.s32.totalorder %s698_s28, %s694_s24 }
 0x24c   : > { %p696_p3 = pnand %p695_p0, %p960_p13 }
 0x24d   : > { %p701_p1 = por %p700_p4, %p699_p5 }
 0x24e   : > { %p697_p2 = pneg %p696_p3 }
 0x250   : > { %p702_p6 = pnand %p701_p1, %p697_p2 }
 0x252   : > { %705 = shalt.err (!%p702_p6)
}
 0x253   : > { %s837_s23 = smov 128   ;;  %s838_s21 = smov 8  }
 0x254   : > { %499 = dma.vmem_to_hbm [thread:$0]  (%p960_p13), %s1033_s22, 256, %s1031_s5, %s1037_s7, %s837_s23, %s837_s23, %s838_s21  }
 0x255   : > { %s839_s26 = smov [#allocation11]  }
 0x256   : > { %s369_s20 = sshll.u32 %s839_s26, 4  ;;  %s370_s20 = int_to_ptr.vmem [resolvable:$true] %s369_s20 }
 0x257   : > { %s706_s8 = scalar_lea.vmem %s370_s20, 16  ;;  %s712_s10 = scalar_lea.vmem %s370_s20, 32 }
 0x258   : > { %p707_p8 = scmp.ne.s32.totalorder %s370_s20, %s706_s8  ;;  %p713_p11 = scmp.lt.s32.totalorder %s370_s20, %s370_s20 }
 0x259   : > { %p714_p12 = scmp.lt.s32.totalorder %s712_s10, %s706_s8 }
 0x25a   : > { %p708_p7 = pnand %p707_p8, %p952_p10 }
 0x25b   : > { %p715_p0 = por %p714_p12, %p713_p11 }
 0x25c   : > { %p709_p9 = pneg %p708_p7 }
 0x25e   : > { %p716_p3 = pnand %p715_p0, %p709_p9 }
 0x260   : > { %719 = shalt.err (!%p716_p3)
}
 0x261   : > { %503 = dma.vmem_to_hbm [thread:$0]  (%p952_p10), %s370_s20, 16, %s1112_s4, [#allocation10]  }
 0x262   : > { %779 = dma.done.wait (%p952_p10), [#allocation10], 32  }
 0x263   : > { %781 = vsyncadd (%p952_p10), [#allocation10], 4294967264 }
 0x264 PF: > { %p522_p13 = scmp.ge.s32.totalorder %s828_s25, 2  ;;  %s389_s14 = sand.u32 1, %s788_s15  }
 0x265   : > { %p1130_p2 = scmp.ne.s32.totalorder %s1128_s30, 0  ;;  %s390_s22 = scalar_lea.sflag [#allocation7], %s389_s14 }
 0x267   : > { %p514_p5 = pnand %p522_p13, %p1130_p2 }
 0x269   : > { %p515_p4 = pneg %p514_p5 }
 0x26b   : > { %783 = dma.done.wait (%p515_p4), %s390_s22, 256  }
 0x26c   : > { %785 = vsyncadd (%p515_p4), %s390_s22, 4294967040  ;;  %s22_s25 = sadd.s32 1, %s828_s25   ;;  %s1131_s12 = sld [smem:[#allocation15_spill]] }
 0x26d   : > { %p19_p1 = scmp.ge.s32.totalorder %s22_s25, 10   ;;  %s1132_s20 = sld [smem:[#allocation20_spill]] }
 0x26e   : > { %s1133_s21 = sld [smem:[#allocation16_spill]]  ;;  %s1137_s15 = smov %s792_s16 }
 0x26f   : > { %s1134_s22 = sld [smem:[#allocation17_spill]]  ;;  %s1138_s16 = smov %s796_s17 }
 0x270   : > { %s1135_s23 = sld [smem:[#allocation18_spill]]  ;;  %s1139_s17 = smov %s965_s18 }
 0x271   : > { %s1136_s24 = sld [smem:[#allocation19_spill]]  ;;  %s1140_s18 = smov %s804_s19 }
 0x272   : > { %s1141_s19 = smov %s1131_s12  ;;  %21 = sbr.rel (!%p19_p1) target bundleno = 10 (0xa), region = 105 }
 0x277   :  { %395 = vsyncpa [#allocation6], 1 }
 0x278   :  { %397 = vsyncpa [#allocation6 + $0x1], 1 }
 0x279   :  { %398 = vsyncpa [#allocation7], 1 }
 0x27a   :  { %400 = vsyncpa [#allocation7 + $0x1], 1 }
 0x27b   :  { %401 = vsyncpa [#allocation10], 1 }

</bundles_post_ra>
